<compile_context>
chip_gen: v7x
topology: tpu7x:2x2x1
jax: 0.10.0
libtpu: 0.0.40
codegen_flags: <defaults>
</compile_context>

<pallas_src>
import jax
import jax.numpy as jnp
from jax import lax
from jax.experimental import pallas as pl
from jax.experimental.pallas import tpu as pltpu

IN_CHANNELS = 3
OUT_CHANNELS = 128
KH = 5
KW = 5
K_RAW = KH * KW * IN_CHANNELS      # 75 real contraction taps
K_PAD = 128                        # contraction dim zero-padded to one MXU tile
BIAS_ROW = K_RAW                   # padded row/column carrying the bias


def _conv_matmul_kernel(p_ref, w_ref, o_ref):
    # p_ref: (M, K_PAD)     im2col patches; column BIAS_ROW == 1.0, rest of pad == 0
    # w_ref: (K_PAD, COUT)  flattened conv weights; row BIAS_ROW == bias, rest == 0
    # o_ref: (M, COUT)      lane/sublane-aligned output slab
    o_ref[...] = jnp.dot(
        p_ref[...], w_ref[...], preferred_element_type=jnp.float32
    ).astype(o_ref.dtype)


def prepare_weights(w_hwio, bias):
    """One-time parameter prep: (kh, kw, ci, cout) -> (K_PAD, COUT) with bias folded in."""
    # channel-major (ci, kh, kw) row order to match conv_general_dilated_patches.
    w_mat = jnp.transpose(w_hwio, (2, 0, 1, 3)).reshape(K_RAW, OUT_CHANNELS)
    w_aug = jnp.zeros((K_PAD, OUT_CHANNELS), dtype=w_mat.dtype)
    w_aug = w_aug.at[:K_RAW, :].set(w_mat)
    w_aug = w_aug.at[BIAS_ROW, :].set(bias.astype(w_mat.dtype))
    return w_aug


@jax.jit
def conv2d_pallas(x_nhwc, w_aug):
    N, H, W, CIN = x_nhwc.shape
    assert CIN == IN_CHANNELS
    OH, OW = H - KH + 1, W - KW + 1
    M = N * OH * OW                                           # 2*12*12 = 288

    # ---- im2col as a single fused HLO (feature order: ci major, (kh, kw) minor) ----
    patches = lax.conv_general_dilated_patches(
        x_nhwc, filter_shape=(KH, KW), window_strides=(1, 1), padding="VALID",
        dimension_numbers=("NHWC", "HWIO", "NHWC"),
        precision=lax.Precision.HIGHEST)                      # (N, OH, OW, 75)
    patches = patches.reshape(M, K_RAW)
    patches = jnp.pad(patches, ((0, 0), (0, K_PAD - K_RAW)))  # (M, 128)
    patches = patches.at[:, BIAS_ROW].set(1.0)                # constant-1 bias column

    # ---- gridless single-shot Pallas call: one (M x 128 x 128) MXU matmul ----
    out2d = pl.pallas_call(
        _conv_matmul_kernel,
        out_shape=jax.ShapeDtypeStruct((M, OUT_CHANNELS), x_nhwc.dtype),
        in_specs=[pl.BlockSpec(memory_space=pltpu.MemorySpace.VMEM),
                  pl.BlockSpec(memory_space=pltpu.MemorySpace.VMEM)],
        out_specs=pl.BlockSpec(memory_space=pltpu.MemorySpace.VMEM),
    )(patches, w_aug)

    # TODO(synk): if N*OH*OW ever scales up (v7x: 64 MiB VMEM, 2 TCs), tile M with
    # grid=(pl.cdiv(M, 512),) and dimension_semantics=("parallel",).
    return out2d.reshape(N, OH, OW, OUT_CHANNELS)


if __name__ == "__main__":
    key = jax.random.PRNGKey(0)
    kx, kwt, kb = jax.random.split(key, 3)

    # small shapes consistent with the module: batch=2, Cin=3, spatial=16
    N, H, W = 2, 16, 16
    x_nchw = jax.random.normal(kx, (N, IN_CHANNELS, H, W), dtype=jnp.float32)

    # deterministic parameter init (shapes follow nn.Conv2d(3, 128, 5))
    fan_in = IN_CHANNELS * KH * KW
    bound = 1.0 / (fan_in ** 0.5)
    w_oihw = jax.random.uniform(
        kwt, (OUT_CHANNELS, IN_CHANNELS, KH, KW),
        minval=-bound, maxval=bound, dtype=jnp.float32)
    bias = jax.random.uniform(
        kb, (OUT_CHANNELS,), minval=-bound, maxval=bound, dtype=jnp.float32)

    # layout glue: NCHW -> NHWC, OIHW -> HWIO; one-time weight prep
    x_nhwc = jnp.transpose(x_nchw, (0, 2, 3, 1))
    w_hwio = jnp.transpose(w_oihw, (2, 3, 1, 0))
    w_aug = prepare_weights(w_hwio, bias)

    out_nhwc = conv2d_pallas(x_nhwc, w_aug)
    out_nchw = jnp.transpose(out_nhwc, (0, 3, 1, 2))          # back to PyTorch layout
    out_nchw = jax.block_until_ready(out_nchw)

    # reference check against XLA conv (same semantics as the PyTorch module)
    ref = lax.conv_general_dilated(
        x_nchw, w_oihw, window_strides=(1, 1), padding="VALID",
        dimension_numbers=("NCHW", "OIHW", "NCHW"),
        precision=lax.Precision.HIGHEST,
    ) + bias[None, :, None, None]

    assert out_nchw.shape == (N, OUT_CHANNELS, H - KH + 1, W - KW + 1)
    assert jnp.allclose(out_nchw, ref, atol=1e-4, rtol=1e-4), "mismatch vs reference conv"

    print("KERNEL_OK")
</pallas_src>

<mosaic_0001>
module attributes {stable_mosaic.version = 11 : i64} {
  func.func @_conv_matmul_kernel(%arg0: memref<288x128xf32, #tpu.memory_space<vmem>>, %arg1: memref<128x128xf32, #tpu.memory_space<vmem>>, %arg2: memref<288x128xf32, #tpu.memory_space<vmem>>) attributes {dimension_semantics = [], scalar_prefetch = 0 : i64, scratch_operands = 0 : i64, tpu.core_type = #tpu.core_type<tc>} {
    %c0 = arith.constant 0 : index
    %c0_0 = arith.constant 0 : index
    %0 = vector.load %arg0[%c0, %c0_0] : memref<288x128xf32, #tpu.memory_space<vmem>>, vector<288x128xf32>
    %c0_1 = arith.constant 0 : index
    %c0_2 = arith.constant 0 : index
    %1 = vector.load %arg1[%c0_1, %c0_2] : memref<128x128xf32, #tpu.memory_space<vmem>>, vector<128x128xf32>
    %cst = arith.constant dense<0.000000e+00> : vector<288x128xf32>
    %2 = tpu.matmul %0, %1, %cst {dimension_numbers = #tpu.dot_dimension_numbers<[1], [0], [0], [1], [0, 0, 1, 1], [], []>} : vector<288x128xf32>, vector<128x128xf32>, vector<288x128xf32> -> vector<288x128xf32>
    %c0_3 = arith.constant 0 : index
    %c0_4 = arith.constant 0 : index
    %3 = vector.load %arg2[%c0_3, %c0_4] : memref<288x128xf32, #tpu.memory_space<vmem>>, vector<288x128xf32>
    tpu.vector_store %arg2[%c0_3, %c0_4], %2 {strides = array<i32>} : memref<288x128xf32, #tpu.memory_space<vmem>>, vector<288x128xf32>,
    return
  }
}

</mosaic_0001>

<bundles_post_ra>
// kernel: conv2d_pallas.1
= control target key start
LH: loop header
LB: loop body
LE: loop exit
PB: predicated region body
PF: predicated region fallthrough
CT: control target
= control target key end

     0   :  { %s813_s1 = inlined_call_operand.vmem [shape: f32[128,128], index: 1, kind: input, shape index: {}]   ;;  %s814_s0 = inlined_call_operand.vmem [shape: f32[288,128], index: 0, kind: input, shape index: {}]   ;;  %s815_s2 = inlined_call_operand.vmem [shape: f32[288,128], index: 2, kind: output, shape index: {}]  }
   0x1   :  { %v47_v0 = vld [vmem:[%s813_s1] sm:$0xff]  ;;  %v48_v1 = vld [vmem:[%s813_s1 + $0x8] sm:$0xff]  ;;  %v49_v2 = vld [vmem:[%s813_s1 + $0x10] sm:$0xff] }
   0x2   :  { %v486_v3 = vpack.c.bf16 %v48_v1, %v47_v0  ;;  %v50_v4 = vld [vmem:[%s813_s1 + $0x18] sm:$0xff]  ;;  %v51_v6 = vld [vmem:[%s813_s1 + $0x20] sm:$0xff]  ;;  %v52_v7 = vld [vmem:[%s813_s1 + $0x28] sm:$0xff] }
   0x3   :  { %v490_v5 = vpack.c.bf16 %v50_v4, %v49_v2  ;;  %v494_v8 = vpack.c.bf16 %v52_v7, %v51_v6  ;;  %v11_v9 = vld [vmem:[%s814_s0] sm:$0xff]  ;;  %v29_v10 = vld [vmem:[%s814_s0 + $0x90] sm:$0xff]  ;;  %v54_v12 = vld [vmem:[%s813_s1 + $0x38] sm:$0xff] }
   0x4   :  { %487 = vmatprep.subr.bf16.mxu0 %v486_v3  ;;  %518 = vmatprep.subr.bf16.mxu1 %v486_v3  ;;  %v53_v11 = vld [vmem:[%s813_s1 + $0x30] sm:$0xff]  ;;  %v55_v14 = vld [vmem:[%s813_s1 + $0x40] sm:$0xff]  ;;  %v56_v15 = vld [vmem:[%s813_s1 + $0x48] sm:$0xff] }
   0x5   :  { %489 = vmatpush3.bf16.msra.mxu0 %v486_v3  ;;  %526 = vmatpush3.bf16.msra.mxu1 %v486_v3  ;;  %v498_v13 = vpack.c.bf16 %v54_v12, %v53_v11  ;;  %v502_v16 = vpack.c.bf16 %v56_v15, %v55_v14  ;;  %v57_v17 = vld [vmem:[%s813_s1 + $0x50] sm:$0xff]  ;;  %v58_v18 = vld [vmem:[%s813_s1 + $0x58] sm:$0xff]  ;;  %v59_v20 = vld [vmem:[%s813_s1 + $0x60] sm:$0xff] }
   0x6   :  { %491 = vmatprep.subr.bf16.mxu0 %v490_v5  ;;  %519 = vmatprep.subr.bf16.mxu1 %v490_v5  ;;  %v506_v19 = vpack.c.bf16 %v58_v18, %v57_v17  ;;  %v60_v21 = vld [vmem:[%s813_s1 + $0x68] sm:$0xff]  ;;  %v61_v23 = vld [vmem:[%s813_s1 + $0x70] sm:$0xff]  ;;  %v62_v24 = vld [vmem:[%s813_s1 + $0x78] sm:$0xff] }
   0x7   :  { %432 = vmatprep.mubr.f32.mxu0 %v11_v9  ;;  %459 = vmatprep.mubr.f32.mxu1 %v29_v10  ;;  %v510_v22 = vpack.c.bf16 %v60_v21, %v59_v20  ;;  %v514_v25 = vpack.c.bf16 %v62_v24, %v61_v23  ;;  %v12_v26 = vld [vmem:[%s814_s0 + $0x8] sm:$0xff]  ;;  %v30_v27 = vld [vmem:[%s814_s0 + $0x98] sm:$0xff]  ;;  %v13_v28 = vld [vmem:[%s814_s0 + $0x10] sm:$0xff] }
   0x8   :  { %v31_v29 = vld [vmem:[%s814_s0 + $0xa0] sm:$0xff]  ;;  %v14_v30 = vld [vmem:[%s814_s0 + $0x18] sm:$0xff]  ;;  %v32_v31 = vld [vmem:[%s814_s0 + $0xa8] sm:$0xff] }
   0x9   :  { %493 = vmatpush3.bf16.msra.mxu0 %v490_v5  ;;  %527 = vmatpush3.bf16.msra.mxu1 %v490_v5  ;;  %v15_v32 = vld [vmem:[%s814_s0 + $0x20] sm:$0xff]  ;;  %v33_v33 = vld [vmem:[%s814_s0 + $0xb0] sm:$0xff]  ;;  %v16_v34 = vld [vmem:[%s814_s0 + $0x28] sm:$0xff] }
   0xa   :  { %495 = vmatprep.subr.bf16.mxu0 %v494_v8  ;;  %520 = vmatprep.subr.bf16.mxu1 %v494_v8  ;;  %v34_v35 = vld [vmem:[%s814_s0 + $0xb8] sm:$0xff]  ;;  %v17_v36 = vld [vmem:[%s814_s0 + $0x30] sm:$0xff]  ;;  %v35_v37 = vld [vmem:[%s814_s0 + $0xc0] sm:$0xff] }
   0xb   :  { %v18_v38 = vld [vmem:[%s814_s0 + $0x38] sm:$0xff]  ;;  %v36_v39 = vld [vmem:[%s814_s0 + $0xc8] sm:$0xff]  ;;  %v19_v40 = vld [vmem:[%s814_s0 + $0x40] sm:$0xff] }
   0xc   :  { %v37_v41 = vld [vmem:[%s814_s0 + $0xd0] sm:$0xff]  ;;  %v20_v42 = vld [vmem:[%s814_s0 + $0x48] sm:$0xff]  ;;  %v38_v43 = vld [vmem:[%s814_s0 + $0xd8] sm:$0xff] }
   0xd   :  { %497 = vmatpush3.bf16.msra.mxu0 %v494_v8  ;;  %528 = vmatpush3.bf16.msra.mxu1 %v494_v8  ;;  %v21_v44 = vld [vmem:[%s814_s0 + $0x50] sm:$0xff]  ;;  %v39_v45 = vld [vmem:[%s814_s0 + $0xe0] sm:$0xff]  ;;  %v22_v46 = vld [vmem:[%s814_s0 + $0x58] sm:$0xff] }
   0xe   :  { %499 = vmatprep.subr.bf16.mxu0 %v498_v13  ;;  %521 = vmatprep.subr.bf16.mxu1 %v498_v13  ;;  %v40_v47 = vld [vmem:[%s814_s0 + $0xe8] sm:$0xff]  ;;  %v23_v48 = vld [vmem:[%s814_s0 + $0x60] sm:$0xff]  ;;  %v41_v49 = vld [vmem:[%s814_s0 + $0xf0] sm:$0xff] }
   0xf   :  { %v24_v50 = vld [vmem:[%s814_s0 + $0x68] sm:$0xff]  ;;  %v42_v51 = vld [vmem:[%s814_s0 + $0xf8] sm:$0xff]  ;;  %v25_v52 = vld [vmem:[%s814_s0 + $0x70] sm:$0xff] }
  0x10   :  { %v43_v53 = vld [vmem:[%s814_s0 + $0x100] sm:$0xff]  ;;  %v26_v54 = vld [vmem:[%s814_s0 + $0x78] sm:$0xff]  ;;  %v44_v55 = vld [vmem:[%s814_s0 + $0x108] sm:$0xff] }
  0x11   :  { %501 = vmatpush3.bf16.msra.mxu0 %v498_v13  ;;  %529 = vmatpush3.bf16.msra.mxu1 %v498_v13  ;;  %v27_v56 = vld [vmem:[%s814_s0 + $0x80] sm:$0xff]  ;;  %v45_v57 = vld [vmem:[%s814_s0 + $0x110] sm:$0xff]  ;;  %v28_v58 = vld [vmem:[%s814_s0 + $0x88] sm:$0xff] }
  0x12   :  { %503 = vmatprep.subr.bf16.mxu0 %v502_v16  ;;  %522 = vmatprep.subr.bf16.mxu1 %v502_v16  ;;  %v46_v59 = vld [vmem:[%s814_s0 + $0x118] sm:$0xff] }
  0x15   :  { %505 = vmatpush3.bf16.msra.mxu0 %v502_v16  ;;  %530 = vmatpush3.bf16.msra.mxu1 %v502_v16 }
  0x16   :  { %507 = vmatprep.subr.bf16.mxu0 %v506_v19  ;;  %523 = vmatprep.subr.bf16.mxu1 %v506_v19 }
  0x19   :  { %509 = vmatpush3.bf16.msra.mxu0 %v506_v19  ;;  %531 = vmatpush3.bf16.msra.mxu1 %v506_v19 }
  0x1a   :  { %511 = vmatprep.subr.bf16.mxu0 %v510_v22  ;;  %524 = vmatprep.subr.bf16.mxu1 %v510_v22 }
  0x1d   :  { %513 = vmatpush3.bf16.msra.mxu0 %v510_v22  ;;  %532 = vmatpush3.bf16.msra.mxu1 %v510_v22 }
  0x1e   :  { %515 = vmatprep.subr.bf16.mxu0 %v514_v25  ;;  %525 = vmatprep.subr.bf16.mxu1 %v514_v25 }
  0x21   :  { %517 = vmatpush3.bf16.msra.mxu0 %v514_v25  ;;  %533 = vmatpush3.bf16.msra.mxu1 %v514_v25 }
  0x24   :  { %433 = vmatmul.mubr.f32.vlgmr.msra.gmra.mrb[0].mxu0 %v12_v26  ;;  %460 = vmatmul.mubr.f32.vlgmr.msra.gmra.mrb[0].mxu1 %v30_v27 }
  0x25   :  { %435 = vmatprep.mubr.f32.mxu0 %v13_v28  ;;  %462 = vmatprep.mubr.f32.mxu1 %v31_v29 }
  0x28   :  { %436 = vmatmul.mubr.f32.gmra.mrb[2].mxu0 %v14_v30  ;;  %463 = vmatmul.mubr.f32.gmra.mrb[2].mxu1 %v32_v31 }
  0x29   :  { %438 = vmatprep.mubr.f32.mxu0 %v15_v32  ;;  %465 = vmatprep.mubr.f32.mxu1 %v33_v33 }
  0x2c   :  { %439 = vmatmul.mubr.f32.gmra.mrb[4].mxu0 %v16_v34  ;;  %466 = vmatmul.mubr.f32.gmra.mrb[4].mxu1 %v34_v35 }
  0x2d   :  { %441 = vmatprep.mubr.f32.mxu0 %v17_v36  ;;  %468 = vmatprep.mubr.f32.mxu1 %v35_v37 }
  0x30   :  { %442 = vmatmul.mubr.f32.gmra.mrb[6].mxu0 %v18_v38  ;;  %469 = vmatmul.mubr.f32.gmra.mrb[6].mxu1 %v36_v39 }
  0x31   :  { %444 = vmatprep.mubr.f32.mxu0 %v19_v40  ;;  %471 = vmatprep.mubr.f32.mxu1 %v37_v41 }
  0x34   :  { %445 = vmatmul.mubr.f32.gmra.mrb[8].mxu0 %v20_v42  ;;  %472 = vmatmul.mubr.f32.gmra.mrb[8].mxu1 %v38_v43 }
  0x35   :  { %447 = vmatprep.mubr.f32.mxu0 %v21_v44  ;;  %474 = vmatprep.mubr.f32.mxu1 %v39_v45 }
  0x38   :  { %448 = vmatmul.mubr.f32.gmra.mrb[10].mxu0 %v22_v46  ;;  %475 = vmatmul.mubr.f32.gmra.mrb[10].mxu1 %v40_v47 }
  0x39   :  { %450 = vmatprep.mubr.f32.mxu0 %v23_v48  ;;  %477 = vmatprep.mubr.f32.mxu1 %v41_v49 }
  0x3c   :  { %451 = vmatmul.mubr.f32.gmra.mrb[12].mxu0 %v24_v50  ;;  %478 = vmatmul.mubr.f32.gmra.mrb[12].mxu1 %v42_v51 }
  0x3d   :  { %453 = vmatprep.mubr.f32.mxu0 %v25_v52  ;;  %480 = vmatprep.mubr.f32.mxu1 %v43_v53 }
  0x40   :  { %454 = vmatmul.mubr.f32.gmra.mrb[14].mxu0 %v26_v54  ;;  %481 = vmatmul.mubr.f32.gmra.mrb[14].mxu1 %v44_v55 }
  0x41   :  { %456 = vmatprep.mubr.f32.mxu0 %v27_v56  ;;  %483 = vmatprep.mubr.f32.mxu1 %v45_v57 }
  0x44   :  { %457 = vmatmul.mubr.f32.gmra.mrb[16].mxu0 %v28_v58  ;;  %484 = vmatmul.mubr.f32.gmra.mrb[16].mxu1 %v46_v59 }
  0xf7   :  { %v434_v60 = vpop.f32.mrb[0].mxu0  ;;  %v461_v61 = vpop.f32.mrb[0].mxu1 }
  0xf8   :  { %309 = vst [vmem:[%s815_s2 + $0x8] sm:$0xff] %v434_v60  ;;  %327 = vst [vmem:[%s815_s2 + $0x98] sm:$0xff] %v461_v61  ;;  %v129_v62 = vpop.f32.mrb[1].mxu0  ;;  %v219_v63 = vpop.f32.mrb[1].mxu1 }
  0xf9   :  { %308 = vst [vmem:[%s815_s2] sm:$0xff] %v129_v62  ;;  %326 = vst [vmem:[%s815_s2 + $0x90] sm:$0xff] %v219_v63 }
  0xfb   :  { %v437_v0 = vpop.f32.mrb[2].mxu0  ;;  %v464_v1 = vpop.f32.mrb[2].mxu1 }
  0xfc   :  { %311 = vst [vmem:[%s815_s2 + $0x18] sm:$0xff] %v437_v0  ;;  %329 = vst [vmem:[%s815_s2 + $0xa8] sm:$0xff] %v464_v1  ;;  %v139_v2 = vpop.f32.mrb[3].mxu0  ;;  %v229_v3 = vpop.f32.mrb[3].mxu1 }
  0xfd   :  { %310 = vst [vmem:[%s815_s2 + $0x10] sm:$0xff] %v139_v2  ;;  %328 = vst [vmem:[%s815_s2 + $0xa0] sm:$0xff] %v229_v3 }
  0xff   :  { %v440_v4 = vpop.f32.mrb[4].mxu0  ;;  %v467_v5 = vpop.f32.mrb[4].mxu1 }
 0x100   :  { %313 = vst [vmem:[%s815_s2 + $0x28] sm:$0xff] %v440_v4  ;;  %331 = vst [vmem:[%s815_s2 + $0xb8] sm:$0xff] %v467_v5  ;;  %v149_v6 = vpop.f32.mrb[5].mxu0  ;;  %v239_v7 = vpop.f32.mrb[5].mxu1 }
 0x101   :  { %312 = vst [vmem:[%s815_s2 + $0x20] sm:$0xff] %v149_v6  ;;  %330 = vst [vmem:[%s815_s2 + $0xb0] sm:$0xff] %v239_v7 }
 0x103   :  { %v443_v8 = vpop.f32.mrb[6].mxu0  ;;  %v470_v9 = vpop.f32.mrb[6].mxu1 }
 0x104   :  { %315 = vst [vmem:[%s815_s2 + $0x38] sm:$0xff] %v443_v8  ;;  %333 = vst [vmem:[%s815_s2 + $0xc8] sm:$0xff] %v470_v9  ;;  %v159_v10 = vpop.f32.mrb[7].mxu0  ;;  %v249_v11 = vpop.f32.mrb[7].mxu1 }
 0x105   :  { %314 = vst [vmem:[%s815_s2 + $0x30] sm:$0xff] %v159_v10  ;;  %332 = vst [vmem:[%s815_s2 + $0xc0] sm:$0xff] %v249_v11 }
 0x107   :  { %v446_v12 = vpop.f32.mrb[8].mxu0  ;;  %v473_v13 = vpop.f32.mrb[8].mxu1 }
 0x108   :  { %317 = vst [vmem:[%s815_s2 + $0x48] sm:$0xff] %v446_v12  ;;  %335 = vst [vmem:[%s815_s2 + $0xd8] sm:$0xff] %v473_v13  ;;  %v169_v14 = vpop.f32.mrb[9].mxu0  ;;  %v259_v15 = vpop.f32.mrb[9].mxu1 }
 0x109   :  { %316 = vst [vmem:[%s815_s2 + $0x40] sm:$0xff] %v169_v14  ;;  %334 = vst [vmem:[%s815_s2 + $0xd0] sm:$0xff] %v259_v15 }
 0x10b   :  { %v449_v16 = vpop.f32.mrb[10].mxu0  ;;  %v476_v17 = vpop.f32.mrb[10].mxu1 }
 0x10c   :  { %319 = vst [vmem:[%s815_s2 + $0x58] sm:$0xff] %v449_v16  ;;  %337 = vst [vmem:[%s815_s2 + $0xe8] sm:$0xff] %v476_v17  ;;  %v179_v18 = vpop.f32.mrb[11].mxu0  ;;  %v269_v19 = vpop.f32.mrb[11].mxu1 }
 0x10d   :  { %318 = vst [vmem:[%s815_s2 + $0x50] sm:$0xff] %v179_v18  ;;  %336 = vst [vmem:[%s815_s2 + $0xe0] sm:$0xff] %v269_v19 }
 0x10f   :  { %v452_v20 = vpop.f32.mrb[12].mxu0  ;;  %v479_v21 = vpop.f32.mrb[12].mxu1 }
 0x110   :  { %321 = vst [vmem:[%s815_s2 + $0x68] sm:$0xff] %v452_v20  ;;  %339 = vst [vmem:[%s815_s2 + $0xf8] sm:$0xff] %v479_v21  ;;  %v189_v22 = vpop.f32.mrb[13].mxu0  ;;  %v279_v23 = vpop.f32.mrb[13].mxu1 }
 0x111   :  { %320 = vst [vmem:[%s815_s2 + $0x60] sm:$0xff] %v189_v22  ;;  %338 = vst [vmem:[%s815_s2 + $0xf0] sm:$0xff] %v279_v23 }
 0x113   :  { %v455_v24 = vpop.f32.mrb[14].mxu0  ;;  %v482_v25 = vpop.f32.mrb[14].mxu1 }
 0x114   :  { %323 = vst [vmem:[%s815_s2 + $0x78] sm:$0xff] %v455_v24  ;;  %341 = vst [vmem:[%s815_s2 + $0x108] sm:$0xff] %v482_v25  ;;  %v199_v26 = vpop.f32.mrb[15].mxu0  ;;  %v289_v27 = vpop.f32.mrb[15].mxu1 }
 0x115   :  { %322 = vst [vmem:[%s815_s2 + $0x70] sm:$0xff] %v199_v26  ;;  %340 = vst [vmem:[%s815_s2 + $0x100] sm:$0xff] %v289_v27 }
 0x117   :  { %v458_v28 = vpop.f32.mrb[16].mxu0  ;;  %v485_v29 = vpop.f32.mrb[16].mxu1 }
 0x118   :  { %325 = vst [vmem:[%s815_s2 + $0x88] sm:$0xff] %v458_v28  ;;  %343 = vst [vmem:[%s815_s2 + $0x118] sm:$0xff] %v485_v29  ;;  %v209_v30 = vpop.f32.mrb[17].mxu0  ;;  %v299_v31 = vpop.f32.mrb[17].mxu1 }
 0x119   :  { %324 = vst [vmem:[%s815_s2 + $0x80] sm:$0xff] %v209_v30  ;;  %342 = vst [vmem:[%s815_s2 + $0x110] sm:$0xff] %v299_v31 }

</bundles_post_ra>
